<compile_context>
chip_gen: v6e
topology: v6e:2x2x1
jax: 0.10.0
libtpu: 0.0.40
codegen_flags: <defaults>
</compile_context>

<pallas_src>
import functools
import math

import jax
import jax.numpy as jnp
from jax.experimental import pallas as pl
from jax.experimental.pallas import tpu as pltpu

LANE = 128


def _round_up(n, m):
    return ((n + m - 1) // m) * m


# ----------------------------- Pallas kernel ------------------------------ #

def _mlp_kernel(x_ref, w_ref, b_ref, bo_ref, o_ref, h_ref, *,
                num_linear, in_features, out_features):
    """Fused MLP on one batch tile.

    x_ref : (tb, in_features)   input tile, natural (un-padded) lane width
    w_ref : (L, Dpad, Dpad)     zero-padded stacked weights (y = x @ W + b layout)
    b_ref : (L-1, 1, Dpad)      zero-padded stacked biases of the tanh layers
    bo_ref: (out_features, 1)   bias of the final linear layer
    o_ref : (out_features, tb)  compact transposed output block (lane width = tb)
    h_ref : (tb, Dpad) VMEM scratch -- single live activation tile
    """
    # Lane-pad the input inside VMEM.  Padded lanes are exact zeros and the
    # corresponding weight rows are zero, so the math is exact.
    h_ref[...] = jnp.zeros_like(h_ref)
    h_ref[:, 0:in_features] = x_ref[...]

    # Hidden layers: Linear + Tanh.  tanh(0) = 0 keeps padded lanes at zero.
    # Layer count is small and static -> unrolled, full LLO visibility; the
    # scratch write each iteration caps the live activation footprint at one tile.
    for li in range(num_linear - 1):
        h_ref[...] = jnp.tanh(
            jnp.dot(h_ref[...], w_ref[li], preferred_element_type=jnp.float32)
            + b_ref[li]
        )

    # Final Linear (no tanh).  Transpose the full (tb, Dpad) result on the XLU,
    # slice the true output rows and store a lane-dense (out_features, tb) block.
    y_t = jnp.dot(h_ref[...], w_ref[num_linear - 1],
                  preferred_element_type=jnp.float32).T          # (Dpad, tb)
    o_ref[...] = (y_t[0:out_features, :] + bo_ref[...]).astype(o_ref.dtype)


# ------------------------------ MLP wrapper ------------------------------- #

def init_mlp_params(key, in_features, out_features, num_layers, num_neurons):
    """Init mimicking PyTorch nn.Linear default U(-1/sqrt(fan_in), +1/sqrt(fan_in)).

    Weights are stored as (in_features, out_features) == transpose of PyTorch's
    `weight`, so the kernel computes y = x @ W + b (same math as x @ weight.T + b).
    """
    dims = [in_features] + [num_neurons] * num_layers + [out_features]
    params = []
    for li in range(len(dims) - 1):
        din, dout = dims[li], dims[li + 1]
        key, kw, kb = jax.random.split(key, 3)
        bound = 1.0 / math.sqrt(din)
        w = jax.random.uniform(kw, (din, dout), jnp.float32, -bound, bound)
        b = jax.random.uniform(kb, (1, dout), jnp.float32, -bound, bound)
        params.append((w, b))
    return params


def pack_mlp_params(params):
    """Zero-pad every layer to a common lane-dense (Dpad, Dpad) and stack.

    Returns:
      w_stack: (L, Dpad, Dpad)  all L linear weights, zero padded
      b_stack: (L-1, 1, Dpad)   biases of the L-1 tanh layers, zero padded
      bo     : (out_features, 1) bias of the final linear layer
    """
    L = len(params)
    assert L >= 2, "MLP always has at least one ConventBlock plus the final Linear"
    dmax = max(max(w.shape) for w, _ in params)
    dpad = _round_up(dmax, LANE)
    out_features = params[-1][0].shape[1]

    w_stack = jnp.zeros((L, dpad, dpad), jnp.float32)
    b_stack = jnp.zeros((L - 1, 1, dpad), jnp.float32)
    for li, (w, b) in enumerate(params):
        din, dout = w.shape
        w_stack = w_stack.at[li, :din, :dout].set(w)
        if li < L - 1:
            b_stack = b_stack.at[li, 0, :dout].set(b.reshape(-1))
    bo = params[-1][1].reshape(out_features, 1).astype(jnp.float32)
    return w_stack, b_stack, bo


def mlp_forward(x, w_stack, b_stack, bo, *, tb=1024):
    """Fused Pallas MLP forward. x: (B, in_features) f32 -> (B, out_features) f32."""
    B, din = x.shape
    L, dpad, _ = w_stack.shape
    out_features = bo.shape[0]
    assert din <= dpad and out_features <= dpad

    # Batch tile: large by default (512-2048 keeps DMA near roofline), always a
    # multiple of 128 so the transposed (out_features, tb) store stays lane-dense,
    # and capped so tiny batches don't over-pad.
    tb = _round_up(max(min(tb, _round_up(B, 128)), 128), 128)
    n_tiles = pl.cdiv(B, tb)
    b_pad = n_tiles * tb

    # Batch-row padding only (last dim stays at its natural width -> no inflated
    # HBM read).  Padded rows are discarded after the kernel.
    x_pad = jnp.pad(x, ((0, b_pad - B), (0, 0))) if b_pad != B else x

    # Scoped-VMEM budget: weights/biases (x2 default buffering), in/out tiles (x2),
    # the activation scratch and a few vreg-spill temps, plus headroom.  Clamp to
    # the v7x 64 MiB per-TensorCore physical limit.
    f32 = 4
    needed = (2 * (w_stack.size + b_stack.size + bo.size
                   + tb * din + out_features * tb) + 6 * tb * dpad) * f32
    vmem_limit = int(min(max(needed + (16 << 20), 32 << 20), 64 << 20))

    cost = pl.CostEstimate(
        flops=int(2 * b_pad * L * dpad * dpad),
        transcendentals=int(b_pad * dpad * (L - 1)),
        bytes_accessed=int((x_pad.size + out_features * b_pad
                            + n_tiles * (w_stack.size + b_stack.size + bo.size)) * f32),
    )

    out_t = pl.pallas_call(
        functools.partial(_mlp_kernel, num_linear=L, in_features=din,
                          out_features=out_features),
        out_shape=jax.ShapeDtypeStruct((out_features, b_pad), jnp.float32),
        grid=(n_tiles,),
        in_specs=[
            # activations: tiled over batch, natural last dim (full extent)
            pl.BlockSpec((tb, din), lambda i: (i, 0)),
            # full stacked weights, constant block -> resident in VMEM
            pl.BlockSpec((L, dpad, dpad), lambda i: (0, 0, 0)),
            # full stacked tanh-layer biases, constant block
            pl.BlockSpec((L - 1, 1, dpad), lambda i: (0, 0, 0)),
            # final-layer bias as an (out_features, 1) column
            pl.BlockSpec((out_features, 1), lambda i: (0, 0)),
        ],
        # compact transposed output: lane width = tb (multiple of 128)
        out_specs=pl.BlockSpec((out_features, tb), lambda i: (0, i)),
        scratch_shapes=[pltpu.VMEM((tb, dpad), jnp.float32)],
        compiler_params=pltpu.CompilerParams(
            dimension_semantics=("parallel",),   # batch tiles shard across TCs (v7x)
            vmem_limit_bytes=vmem_limit,
        ),
        cost_estimate=cost,
    )(x_pad, w_stack, b_stack, bo)

    # Cheap final slice + transpose of the tiny (out_features, b_pad) result.
    return out_t[:, :B].T


def mlp_forward_ref(x, params):
    """Plain-JAX reference matching MLP.forward (tanh on every layer but the last)."""
    n = len(params)
    h = x
    for li, (w, b) in enumerate(params):
        h = h @ w + b
        if li < n - 1:
            h = jnp.tanh(h)
    return h


# --------------------------------- main ----------------------------------- #

if __name__ == "__main__":
    # Small PINN-like configuration: 2-D coordinates in, 1 scalar out.
    in_features, out_features = 2, 1
    num_layers, num_neurons = 3, 32
    batch = 200                       # deliberately NOT a multiple of the tile

    key = jax.random.PRNGKey(0)
    key, kx = jax.random.split(key)
    x = jax.random.normal(kx, (batch, in_features), jnp.float32)

    params = init_mlp_params(key, in_features, out_features, num_layers, num_neurons)
    w_stack, b_stack, bo = pack_mlp_params(params)

    # tb=128 here so the small demo still exercises multiple grid steps + batch padding.
    out = mlp_forward(x, w_stack, b_stack, bo, tb=128)
    out = jax.block_until_ready(out)

    ref = mlp_forward_ref(x, params)
    assert out.shape == (batch, out_features)
    assert jnp.allclose(out, ref, atol=1e-5, rtol=1e-5), "Pallas MLP mismatch vs reference"

    print("KERNEL_OK")
</pallas_src>

<mosaic_0001>
module attributes {stable_mosaic.version = 11 : i64} {
  func.func @_mlp_kernel(%arg0: i32, %arg1: memref<128x2xf32, #tpu.memory_space<vmem>>, %arg2: memref<4x128x128xf32, #tpu.memory_space<vmem>>, %arg3: memref<3x1x128xf32, #tpu.memory_space<vmem>>, %arg4: memref<1x1xf32, #tpu.memory_space<vmem>>, %arg5: memref<1x128xf32, #tpu.memory_space<vmem>>, %arg6: memref<128x128xf32, #tpu.memory_space<vmem>>) attributes {dimension_semantics = [#tpu.dimension_semantics<parallel>], iteration_bounds = array<i64: 2>, scalar_prefetch = 0 : i64, scratch_operands = 1 : i64, tpu.core_type = #tpu.core_type<tc>, window_params = [{transform_indices = @transform_0, window_bounds = array<i64: 128, 2>}, {pipeline_mode = #tpu.pipeline_mode<synchronous>, transform_indices = @transform_1, window_bounds = array<i64: 4, 128, 128>}, {pipeline_mode = #tpu.pipeline_mode<synchronous>, transform_indices = @transform_2, window_bounds = array<i64: 3, 1, 128>}, {pipeline_mode = #tpu.pipeline_mode<synchronous>, transform_indices = @transform_3, window_bounds = array<i64: 1, 1>}, {transform_indices = @transform_4, window_bounds = array<i64: 1, 128>}]} {
    %cst = arith.constant 0.000000e+00 : f32
    %0 = vector.broadcast %cst : f32 to vector<128x128xf32>
    %c0 = arith.constant 0 : index
    %c0_0 = arith.constant 0 : index
    %1 = vector.load %arg6[%c0, %c0_0] : memref<128x128xf32, #tpu.memory_space<vmem>>, vector<128x128xf32>
    tpu.vector_store %arg6[%c0, %c0_0], %0 {strides = array<i32>} : memref<128x128xf32, #tpu.memory_space<vmem>>, vector<128x128xf32>,
    %c0_1 = arith.constant 0 : index
    %c0_2 = arith.constant 0 : index
    %2 = vector.load %arg1[%c0_1, %c0_2] : memref<128x2xf32, #tpu.memory_space<vmem>>, vector<128x2xf32>
    %c0_3 = arith.constant 0 : index
    %c0_4 = arith.constant 0 : index
    %3 = vector.load %arg6[%c0_3, %c0_4] : memref<128x128xf32, #tpu.memory_space<vmem>>, vector<128x2xf32>
    tpu.vector_store %arg6[%c0_3, %c0_4], %2 {strides = array<i32>} : memref<128x128xf32, #tpu.memory_space<vmem>>, vector<128x2xf32>,
    %c0_5 = arith.constant 0 : index
    %c0_6 = arith.constant 0 : index
    %4 = vector.load %arg6[%c0_5, %c0_6] : memref<128x128xf32, #tpu.memory_space<vmem>>, vector<128x128xf32>
    %c0_7 = arith.constant 0 : index
    %c0_8 = arith.constant 0 : index
    %c0_9 = arith.constant 0 : index
    %5 = vector.load %arg2[%c0_7, %c0_8, %c0_9] : memref<4x128x128xf32, #tpu.memory_space<vmem>>, vector<1x128x128xf32>
    %6 = vector.shape_cast %5 : vector<1x128x128xf32> to vector<128x128xf32>
    %cst_10 = arith.constant dense<0.000000e+00> : vector<128x128xf32>
    %7 = tpu.matmul %4, %6, %cst_10 {dimension_numbers = #tpu.dot_dimension_numbers<[1], [0], [0], [1], [0, 0, 1, 1], [], []>} : vector<128x128xf32>, vector<128x128xf32>, vector<128x128xf32> -> vector<128x128xf32>
    %c0_11 = arith.constant 0 : index
    %c0_12 = arith.constant 0 : index
    %c0_13 = arith.constant 0 : index
    %8 = vector.load %arg3[%c0_11, %c0_12, %c0_13] : memref<3x1x128xf32, #tpu.memory_space<vmem>>, vector<1x1x128xf32>
    %9 = vector.shape_cast %8 : vector<1x1x128xf32> to vector<1x128xf32>
    %10 = vector.broadcast %9 : vector<1x128xf32> to vector<128x128xf32>
    %11 = arith.addf %7, %10 : vector<128x128xf32>
    %12 = math.tanh %11 : vector<128x128xf32>
    %c0_14 = arith.constant 0 : index
    %c0_15 = arith.constant 0 : index
    %13 = vector.load %arg6[%c0_14, %c0_15] : memref<128x128xf32, #tpu.memory_space<vmem>>, vector<128x128xf32>
    tpu.vector_store %arg6[%c0_14, %c0_15], %12 {strides = array<i32>} : memref<128x128xf32, #tpu.memory_space<vmem>>, vector<128x128xf32>,
    %c0_16 = arith.constant 0 : index
    %c0_17 = arith.constant 0 : index
    %14 = vector.load %arg6[%c0_16, %c0_17] : memref<128x128xf32, #tpu.memory_space<vmem>>, vector<128x128xf32>
    %c1 = arith.constant 1 : index
    %c0_18 = arith.constant 0 : index
    %c0_19 = arith.constant 0 : index
    %15 = vector.load %arg2[%c1, %c0_18, %c0_19] : memref<4x128x128xf32, #tpu.memory_space<vmem>>, vector<1x128x128xf32>
    %16 = vector.shape_cast %15 : vector<1x128x128xf32> to vector<128x128xf32>
    %cst_20 = arith.constant dense<0.000000e+00> : vector<128x128xf32>
    %17 = tpu.matmul %14, %16, %cst_20 {dimension_numbers = #tpu.dot_dimension_numbers<[1], [0], [0], [1], [0, 0, 1, 1], [], []>} : vector<128x128xf32>, vector<128x128xf32>, vector<128x128xf32> -> vector<128x128xf32>
    %c1_21 = arith.constant 1 : index
    %c0_22 = arith.constant 0 : index
    %c0_23 = arith.constant 0 : index
    %18 = vector.load %arg3[%c1_21, %c0_22, %c0_23] : memref<3x1x128xf32, #tpu.memory_space<vmem>>, vector<1x1x128xf32>
    %19 = vector.shape_cast %18 : vector<1x1x128xf32> to vector<1x128xf32>
    %20 = vector.broadcast %19 : vector<1x128xf32> to vector<128x128xf32>
    %21 = arith.addf %17, %20 : vector<128x128xf32>
    %22 = math.tanh %21 : vector<128x128xf32>
    %c0_24 = arith.constant 0 : index
    %c0_25 = arith.constant 0 : index
    %23 = vector.load %arg6[%c0_24, %c0_25] : memref<128x128xf32, #tpu.memory_space<vmem>>, vector<128x128xf32>
    tpu.vector_store %arg6[%c0_24, %c0_25], %22 {strides = array<i32>} : memref<128x128xf32, #tpu.memory_space<vmem>>, vector<128x128xf32>,
    %c0_26 = arith.constant 0 : index
    %c0_27 = arith.constant 0 : index
    %24 = vector.load %arg6[%c0_26, %c0_27] : memref<128x128xf32, #tpu.memory_space<vmem>>, vector<128x128xf32>
    %c2 = arith.constant 2 : index
    %c0_28 = arith.constant 0 : index
    %c0_29 = arith.constant 0 : index
    %25 = vector.load %arg2[%c2, %c0_28, %c0_29] : memref<4x128x128xf32, #tpu.memory_space<vmem>>, vector<1x128x128xf32>
    %26 = vector.shape_cast %25 : vector<1x128x128xf32> to vector<128x128xf32>
    %cst_30 = arith.constant dense<0.000000e+00> : vector<128x128xf32>
    %27 = tpu.matmul %24, %26, %cst_30 {dimension_numbers = #tpu.dot_dimension_numbers<[1], [0], [0], [1], [0, 0, 1, 1], [], []>} : vector<128x128xf32>, vector<128x128xf32>, vector<128x128xf32> -> vector<128x128xf32>
    %c2_31 = arith.constant 2 : index
    %c0_32 = arith.constant 0 : index
    %c0_33 = arith.constant 0 : index
    %28 = vector.load %arg3[%c2_31, %c0_32, %c0_33] : memref<3x1x128xf32, #tpu.memory_space<vmem>>, vector<1x1x128xf32>
    %29 = vector.shape_cast %28 : vector<1x1x128xf32> to vector<1x128xf32>
    %30 = vector.broadcast %29 : vector<1x128xf32> to vector<128x128xf32>
    %31 = arith.addf %27, %30 : vector<128x128xf32>
    %32 = math.tanh %31 : vector<128x128xf32>
    %c0_34 = arith.constant 0 : index
    %c0_35 = arith.constant 0 : index
    %33 = vector.load %arg6[%c0_34, %c0_35] : memref<128x128xf32, #tpu.memory_space<vmem>>, vector<128x128xf32>
    tpu.vector_store %arg6[%c0_34, %c0_35], %32 {strides = array<i32>} : memref<128x128xf32, #tpu.memory_space<vmem>>, vector<128x128xf32>,
    %c0_36 = arith.constant 0 : index
    %c0_37 = arith.constant 0 : index
    %34 = vector.load %arg6[%c0_36, %c0_37] : memref<128x128xf32, #tpu.memory_space<vmem>>, vector<128x128xf32>
    %c3 = arith.constant 3 : index
    %c0_38 = arith.constant 0 : index
    %c0_39 = arith.constant 0 : index
    %35 = vector.load %arg2[%c3, %c0_38, %c0_39] : memref<4x128x128xf32, #tpu.memory_space<vmem>>, vector<1x128x128xf32>
    %36 = vector.shape_cast %35 : vector<1x128x128xf32> to vector<128x128xf32>
    %cst_40 = arith.constant dense<0.000000e+00> : vector<128x128xf32>
    %37 = tpu.matmul %34, %36, %cst_40 {dimension_numbers = #tpu.dot_dimension_numbers<[1], [0], [0], [1], [0, 0, 1, 1], [], []>} : vector<128x128xf32>, vector<128x128xf32>, vector<128x128xf32> -> vector<128x128xf32>
    %38 = tpu.transpose %37, [1, 0] : vector<128x128xf32> -> vector<128x128xf32>
    %39 = vector.extract_strided_slice %38 {offsets = [0, 0], sizes = [1, 128], strides = [1, 1]} : vector<128x128xf32> to vector<1x128xf32>
    %c0_41 = arith.constant 0 : index
    %c0_42 = arith.constant 0 : index
    %40 = vector.load %arg4[%c0_41, %c0_42] : memref<1x1xf32, #tpu.memory_space<vmem>>, vector<1x1xf32>
    %41 = vector.broadcast %40 : vector<1x1xf32> to vector<1x128xf32>
    %42 = arith.addf %39, %41 : vector<1x128xf32>
    %c0_43 = arith.constant 0 : index
    %c0_44 = arith.constant 0 : index
    %43 = vector.load %arg5[%c0_43, %c0_44] : memref<1x128xf32, #tpu.memory_space<vmem>>, vector<1x128xf32>
    tpu.vector_store %arg5[%c0_43, %c0_44], %42 {strides = array<i32>} : memref<1x128xf32, #tpu.memory_space<vmem>>, vector<1x128xf32>,
    return
  }
  func.func @transform_0(%arg0: i32) -> (i32, i32) {
    %c0_i32 = arith.constant 0 : i32
    %c0_i32_0 = arith.constant 0 : i32
    return %arg0, %c0_i32 : i32, i32
  }
  func.func @transform_1(%arg0: i32) -> (i32, i32, i32) {
    %c0_i32 = arith.constant 0 : i32
    %c0_i32_0 = arith.constant 0 : i32
    %c0_i32_1 = arith.constant 0 : i32
    %c0_i32_2 = arith.constant 0 : i32
    return %c0_i32, %c0_i32_0, %c0_i32_1 : i32, i32, i32
  }
  func.func @transform_2(%arg0: i32) -> (i32, i32, i32) {
    %c0_i32 = arith.constant 0 : i32
    %c0_i32_0 = arith.constant 0 : i32
    %c0_i32_1 = arith.constant 0 : i32
    %c0_i32_2 = arith.constant 0 : i32
    return %c0_i32, %c0_i32_0, %c0_i32_1 : i32, i32, i32
  }
  func.func @transform_3(%arg0: i32) -> (i32, i32) {
    %c0_i32 = arith.constant 0 : i32
    %c0_i32_0 = arith.constant 0 : i32
    %c0_i32_1 = arith.constant 0 : i32
    return %c0_i32, %c0_i32_0 : i32, i32
  }
  func.func @transform_4(%arg0: i32) -> (i32, i32) {
    %c0_i32 = arith.constant 0 : i32
    %c0_i32_0 = arith.constant 0 : i32
    return %c0_i32, %arg0 : i32, i32
  }
}

</mosaic_0001>

<bundles_post_ra>
// kernel: tpu_custom_call.1
= control target key start
LH: loop header
LB: loop body
LE: loop exit
PB: predicated region body
PF: predicated region fallthrough
CT: control target
= control target key end

     0   :  { %s2033_s0 = inlined_call_operand.vmem [shape: f32[256,2], index: 0, kind: input, shape index: {}]   ;;  %s2034_s1 = inlined_call_operand.hbm [shape: f32[4,128,128], index: 1, kind: input, shape index: {}]   ;;  %s2035_s2 = inlined_call_operand.vmem [shape: f32[3,1,128], index: 2, kind: input, shape index: {}]   ;;  %s2036_s3 = inlined_call_operand.<no memory space> [shape: f32[1,1], index: 3, kind: input, shape index: {}]   ;;  %s2037_s4 = inlined_call_operand.hbm [shape: f32[1,256], index: 4, kind: output, shape index: {}]  }
   0x1   :  { %v9_v0 = vstv %s2036_s3 }
   0x2   :  { %10 = vst [vmem:[#allocation3] sm:$0x1] %v9_v0 }
   0x3   :  { %11 = vsyncpa [#allocation5], 0 }
   0x4   :  { %12 = vsyncpa [#allocation6], 0 }
   0x5   :  { %14 = vsyncpa [#allocation6 + $0x1], 0  ;;  %s1862_s17 = smov 0   ;;  %s1864_s18 = smov 0  }
   0x6   :  { %s1866_s19 = smov 0   ;;  %s1868_s20 = smov 0  }
   0x7 LB: > { %s1883_s3 = sadd.s32 4294967295, %s1826_s20   ;;  %s1217_s21 = sadd.s32 4294967294, %s1826_s20   ;;  %s1826_s20 = sphi %s1868_s20, %s2045_s20   ;;  %s1822_s19 = sphi %s1866_s19, %s2044_s19   ;;  %s1818_s18 = sphi %s1864_s18, %s2043_s18   ;;  %s1814_s17 = sphi %s1862_s17, %s2042_s17  }
   0x8   : > { %s1887_s22 = sadd.s32 1, %s1826_s20   ;;  %s116_s23 = sadd.s32 1, %s1822_s19 }
   0x9   : > { %s113_s24 = ssub.s32 %s1826_s20, %s1887_s22  ;;  %p126_p0 = scmp.ne.s32.totalorder %s1822_s19, %s1818_s18 }
   0xa   : > { %p114_p1 = scmp.eq.s32.totalorder %s113_s24, 0  ;;  %p127_p2 = scmp.eq.s32.totalorder %s1883_s3, 1 }
   0xb   : > { %p132_p3 = scmp.ne.s32.totalorder %s1818_s18, %s1814_s17  ;;  %p133_p4 = scmp.eq.s32.totalorder %s1217_s21, 1 }
   0xc   : > { %s1898_s25 = scalar_select %p114_p1, %s1822_s19, %s116_s23  }
   0xd   : > { %p1900_p5 = por %p127_p2, %p126_p0  ;;  %p1904_p6 = por %p133_p4, %p132_p3 }
   0xe   : > { %p1218_p7 = scmp.ge.s32.totalorder %s1826_s20, 1  ;;  %p140_p8 = scmp.lt.s32.totalorder %s1826_s20, 3 }
   0xf   : > { %s2039_s27 = scalar_select %p1904_p6, 1, 0 }
  0x10   : > { %p1599_p9 = scmp.eq.s32.totalorder %s1883_s3, 0  ;;  %p1911_p10 = pnand %p1218_p7, %p140_p8 }
  0x11   : > { %s1828_s29 = smov [#allocation4]  }
  0x12   : > { %s152_s30 = sshll.u32 %s1828_s29, 4  ;;  %p1591_p11 = pneg %p1911_p10  ;;  %s153_s30 = int_to_ptr.vmem [resolvable:$true] %s152_s30 }
  0x13   : > { %s1747_s5 = scalar_lea.vmem %s153_s30, 8192  ;;  %p1755_p3 = scmp.lt.s32.totalorder %s153_s30, %s153_s30 }
  0x14   : > { %p1592_p12 = pnand %p1599_p9, %p1591_p11  ;;  %p1748_p0 = scmp.ne.s32.totalorder %s153_s30, %s1747_s5 }
  0x15   : > { %p1756_p4 = scmp.lt.s32.totalorder %s1747_s5, %s1747_s5 }
  0x16   : > { %p1738_p13 = pneg %p1592_p12 }
  0x17   : > { %p1757_p6 = por %p1756_p4, %p1755_p3 }
  0x18   : > { %p1750_p1 = pnand %p1748_p0, %p1738_p13 }
  0x1a   : > { %p1751_p2 = pneg %p1750_p1 }
  0x1c   : > { %p1758_p7 = pnand %p1757_p6, %p1751_p2 }
  0x1e   : > { %1761 = shalt.err (!%p1758_p7)
}
  0x1f   : > { %s1829_s6 = smov 128   ;;  %s1830_s7 = smov 8  }
  0x20   : > { %1594 = dma.hbm_to_vmem [thread:$0]  (!%p1592_p12), %s2034_s1, 8192, %s153_s30, [#allocation5], %s1829_s6, %s1829_s6, %s1830_s7  }
  0x21   : > { %183 = sbr.rel (%p1911_p10) target bundleno = 1043 (0x413), region = 36 }
  0x26   : > { %1805 = dma.done.wait (%p1599_p9), [#allocation5], 8192  }
  0x27   : > { %1807 = vsyncadd (%p1599_p9), [#allocation5], 4294959104  ;;  %s1929_s10 = sshll.u32 %s1883_s3, 4  ;;  %v1831_v1 = vmov 0.0   ;;  %v294_v2 = vld [vmem:[#allocation4 + $0x78] sm:$0xff]  ;;  %v293_v3 = vld [vmem:[#allocation4 + $0x70] sm:$0xff] }
  0x28   : > { %p209_p6 = scmp.lt.s32.totalorder %s1929_s10, 31  ;;  %214 = vst [vmem:[#allocation2] sm:$0xff] %v1831_v1  ;;  %215 = vst [vmem:[#allocation2 + $0x8] sm:$0xff] %v1831_v1  ;;  %1361 = vmatprep.subr.mxu0 %v294_v2  ;;  %v292_v4 = vld [vmem:[#allocation4 + $0x68] sm:$0xff]  ;;  %vm246_vm0 = vcmask 15360   ;;  %v291_v5 = vld [vmem:[#allocation4 + $0x60] sm:$0xff]  ;;  %s1148_s8 = scalar_lea.hbm %s2037_s4, %s1929_s10 }
  0x29   : > { %216 = vst [vmem:[#allocation2 + $0x10] sm:$0xff] %v1831_v1  ;;  %217 = vst [vmem:[#allocation2 + $0x18] sm:$0xff] %v1831_v1  ;;  %1362 = vmatpush3.msra.mxu0 %v294_v2  ;;  %v290_v6 = vld [vmem:[#allocation4 + $0x58] sm:$0xff]  ;;  %v289_v9 = vld [vmem:[#allocation4 + $0x50] sm:$0xff]  ;;  %s206_s29 = sand.u32 1, %s1818_s18  }
  0x2a   : > { %218 = vst [vmem:[#allocation2 + $0x20] sm:$0xff] %v1831_v1  ;;  %219 = vst [vmem:[#allocation2 + $0x28] sm:$0xff] %v1831_v1  ;;  %s210_s11 = scalar_select %p209_p6, %s1929_s10, 31  ;;  %1363 = vmatprep.subr.mxu0 %v293_v3  ;;  %v288_v16 = vld [vmem:[#allocation4 + $0x48] sm:$0xff]  ;;  %v511_v25 = vld [vmem:[#allocation4 + $0xf8] sm:$0xff] }
  0x2b   : > { %220 = vst [vmem:[#allocation2 + $0x30] sm:$0xff] %v1831_v1  ;;  %221 = vst [vmem:[#allocation2 + $0x38] sm:$0xff] %v1831_v1  ;;  %1364 = vmatpush3.msra.mxu0 %v293_v3  ;;  %1417 = vmatprep.subr.mxu1 %v511_v25  ;;  %v510_v26 = vld [vmem:[#allocation4 + $0xf0] sm:$0xff]  ;;  %v287_v27 = vld [vmem:[#allocation4 + $0x40] sm:$0xff]  ;;  %s207_s30 = scalar_lea.vmem [#allocation7], %s206_s29  ;;  %s1138_s9 = scalar_lea.sflag [#allocation6], %s206_s29 }
  0x2c   : > { %222 = vst [vmem:[#allocation2 + $0x40] sm:$0xff] %v1831_v1  ;;  %223 = vst [vmem:[#allocation2 + $0x48] sm:$0xff] %v1831_v1  ;;  %s1224_s12 = sshll.u32 %s210_s11, 3  ;;  %1365 = vmatprep.subr.mxu0 %v292_v4  ;;  %1418 = vmatpush3.msra.mxu1 %v511_v25  ;;  %v286_v29 = vld [vmem:[#allocation4 + $0x38] sm:$0xff]  ;;  %v285_v30 = vld [vmem:[#allocation4 + $0x30] sm:$0xff]  ;;  %s1150_s5 = sshll.u32 %s207_s30, 4  ;;  %s1151_s5 = int_to_ptr.vmem [resolvable:$true] %s1150_s5 }
  0x2d   : > { %224 = vst [vmem:[#allocation2 + $0x50] sm:$0xff] %v1831_v1  ;;  %225 = vst [vmem:[#allocation2 + $0x58] sm:$0xff] %v1831_v1  ;;  %s1938_s15 = scalar_lea.vmem %s2033_s0, %s1224_s12  ;;  %1366 = vmatpush3.msra.mxu0 %v292_v4  ;;  %1419 = vmatprep.subr.mxu1 %v510_v26  ;;  %v284_v31 = vld [vmem:[#allocation4 + $0x28] sm:$0xff]  ;;  %v283_v32 = vld [vmem:[#allocation4 + $0x20] sm:$0xff]  ;;  %s1762_s11 = scalar_lea.vmem %s1151_s5, 16 }
  0x2e   : > { %226 = vst [vmem:[#allocation2 + $0x60] sm:$0xff] %v1831_v1  ;;  %227 = vst [vmem:[#allocation2 + $0x68] sm:$0xff] %v1831_v1  ;;  %v230_v7 = vld [vmem:[%s1938_s15] sm:$0xff]  ;;  %v231_v8 = vld [vmem:[%s1938_s15 + $0x8] sm:$0xff]  ;;  %1367 = vmatprep.subr.mxu0 %v291_v5  ;;  %1420 = vmatpush3.msra.mxu1 %v510_v26  ;;  %p1763_p8 = scmp.ne.s32.totalorder %s1151_s5, %s1762_s11  ;;  %s1833_s12 = smov [#allocation7]  }
  0x2f   : > { %228 = vst [vmem:[#allocation2 + $0x70] sm:$0xff] %v1831_v1  ;;  %229 = vst [vmem:[#allocation2 + $0x78] sm:$0xff] %v1831_v1  ;;  %v232_v10 = vld [vmem:[%s1938_s15 + $0x10] sm:$0xff]  ;;  %v233_v11 = vld [vmem:[%s1938_s15 + $0x18] sm:$0xff]  ;;  %1368 = vmatpush3.msra.mxu0 %v291_v5  ;;  %s1766_s13 = sshll.u32 %s1833_s12, 4  ;;  %s1767_s13 = int_to_ptr.vmem [resolvable:$false] %s1766_s13 }
  0x30   : > { %247 = vst.msk [vmem:[#allocation2] sm:$0xff] %vm246_vm0, %v230_v7  ;;  %248 = vst.msk [vmem:[#allocation2 + $0x8] sm:$0xff] %vm246_vm0, %v231_v8  ;;  %v234_v12 = vld [vmem:[%s1938_s15 + $0x20] sm:$0xff]  ;;  %v235_v13 = vld [vmem:[%s1938_s15 + $0x28] sm:$0xff]  ;;  %1369 = vmatprep.subr.mxu0 %v290_v6  ;;  %p1764_p9 = pnand %p1763_p8, %p1900_p5  ;;  %s1768_s14 = scalar_lea.vmem %s1767_s13, 32 }
  0x31   : > { %249 = vst.msk [vmem:[#allocation2 + $0x10] sm:$0xff] %vm246_vm0, %v232_v10  ;;  %250 = vst.msk [vmem:[#allocation2 + $0x18] sm:$0xff] %vm246_vm0, %v233_v11  ;;  %v236_v14 = vld [vmem:[%s1938_s15 + $0x30] sm:$0xff]  ;;  %v237_v15 = vld [vmem:[%s1938_s15 + $0x38] sm:$0xff]  ;;  %1370 = vmatpush3.msra.mxu0 %v290_v6  ;;  %p1769_p11 = scmp.lt.s32.totalorder %s1151_s5, %s1767_s13  ;;  %p1770_p12 = scmp.lt.s32.totalorder %s1768_s14, %s1762_s11 }
  0x32   : > { %251 = vst.msk [vmem:[#allocation2 + $0x20] sm:$0xff] %vm246_vm0, %v234_v12  ;;  %252 = vst.msk [vmem:[#allocation2 + $0x28] sm:$0xff] %vm246_vm0, %v235_v13  ;;  %v238_v17 = vld [vmem:[%s1938_s15 + $0x40] sm:$0xff]  ;;  %v239_v18 = vld [vmem:[%s1938_s15 + $0x48] sm:$0xff]  ;;  %1371 = vmatprep.subr.mxu0 %v289_v9  ;;  %p1765_p10 = pneg %p1764_p9 }
  0x33   : > { %253 = vst.msk [vmem:[#allocation2 + $0x30] sm:$0xff] %vm246_vm0, %v236_v14  ;;  %254 = vst.msk [vmem:[#allocation2 + $0x38] sm:$0xff] %vm246_vm0, %v237_v15  ;;  %v240_v19 = vld [vmem:[%s1938_s15 + $0x50] sm:$0xff]  ;;  %v241_v20 = vld [vmem:[%s1938_s15 + $0x58] sm:$0xff]  ;;  %1372 = vmatpush3.msra.mxu0 %v289_v9  ;;  %p1771_p13 = por %p1770_p12, %p1769_p11 }
  0x34   : > { %255 = vst.msk [vmem:[#allocation2 + $0x40] sm:$0xff] %vm246_vm0, %v238_v17  ;;  %256 = vst.msk [vmem:[#allocation2 + $0x48] sm:$0xff] %vm246_vm0, %v239_v18  ;;  %v242_v21 = vld [vmem:[%s1938_s15 + $0x60] sm:$0xff]  ;;  %v243_v22 = vld [vmem:[%s1938_s15 + $0x68] sm:$0xff]  ;;  %1373 = vmatprep.subr.mxu0 %v288_v16 }
  0x35   : > { %257 = vst.msk [vmem:[#allocation2 + $0x50] sm:$0xff] %vm246_vm0, %v240_v19  ;;  %258 = vst.msk [vmem:[#allocation2 + $0x58] sm:$0xff] %vm246_vm0, %v241_v20  ;;  %v244_v23 = vld [vmem:[%s1938_s15 + $0x70] sm:$0xff]  ;;  %v245_v24 = vld [vmem:[%s1938_s15 + $0x78] sm:$0xff]  ;;  %1374 = vmatpush3.msra.mxu0 %v288_v16  ;;  %p1772_p0 = pnand %p1771_p13, %p1765_p10 }
  0x36   : > { %259 = vst.msk [vmem:[#allocation2 + $0x60] sm:$0xff] %vm246_vm0, %v242_v21  ;;  %260 = vst.msk [vmem:[#allocation2 + $0x68] sm:$0xff] %vm246_vm0, %v243_v22  ;;  %1375 = vmatprep.subr.mxu0 %v287_v27  ;;  %v282_v33 = vld [vmem:[#allocation4 + $0x18] sm:$0xff]  ;;  %v281_v34 = vld [vmem:[#allocation4 + $0x10] sm:$0xff] }
  0x37   : > { %261 = vst.msk [vmem:[#allocation2 + $0x70] sm:$0xff] %vm246_vm0, %v244_v23  ;;  %262 = vst.msk [vmem:[#allocation2 + $0x78] sm:$0xff] %vm246_vm0, %v245_v24  ;;  %v263_v28 = vld [vmem:[#allocation2] sm:$0xff]  ;;  %1376 = vmatpush3.msra.mxu0 %v287_v27  ;;  %v280_v35 = vld [vmem:[#allocation4 + $0x8] sm:$0xff] }
  0x38   : > { %1393 = vmatprep.mubr.f32.mxu0 %v263_v28  ;;  %1377 = vmatprep.subr.mxu0 %v286_v29  ;;  %v279_v36 = vld [vmem:[#allocation4] sm:$0xff]  ;;  %v265_v38 = vld [vmem:[#allocation2 + $0x10] sm:$0xff]  ;;  %v266_v39 = vld [vmem:[#allocation2 + $0x18] sm:$0xff] }
  0x39   : > { %1378 = vmatpush3.msra.mxu0 %v286_v29  ;;  %v264_v37 = vld [vmem:[#allocation2 + $0x8] sm:$0xff]  ;;  %v267_v40 = vld [vmem:[#allocation2 + $0x20] sm:$0xff]  ;;  %v506_v55 = vld [vmem:[#allocation4 + $0xd0] sm:$0xff] }
  0x3a   : > { %1379 = vmatprep.subr.mxu0 %v285_v30  ;;  %v268_v41 = vld [vmem:[#allocation2 + $0x28] sm:$0xff]  ;;  %v269_v42 = vld [vmem:[#allocation2 + $0x30] sm:$0xff]  ;;  %v270_v43 = vld [vmem:[#allocation2 + $0x38] sm:$0xff] }
  0x3b   : > { %1380 = vmatpush3.msra.mxu0 %v285_v30  ;;  %v271_v44 = vld [vmem:[#allocation2 + $0x40] sm:$0xff]  ;;  %v272_v45 = vld [vmem:[#allocation2 + $0x48] sm:$0xff]  ;;  %v502_v59 = vld [vmem:[#allocation4 + $0xb0] sm:$0xff] }
  0x3c   : > { %1381 = vmatprep.subr.mxu0 %v284_v31  ;;  %v273_v46 = vld [vmem:[#allocation2 + $0x50] sm:$0xff]  ;;  %v274_v47 = vld [vmem:[#allocation2 + $0x58] sm:$0xff]  ;;  %v508_v53 = vld [vmem:[#allocation4 + $0xe0] sm:$0xff] }
  0x3d   : > { %1382 = vmatpush3.msra.mxu0 %v284_v31  ;;  %v275_v48 = vld [vmem:[#allocation2 + $0x60] sm:$0xff]  ;;  %v276_v49 = vld [vmem:[#allocation2 + $0x68] sm:$0xff]  ;;  %v498_v63 = vld [vmem:[#allocation4 + $0x90] sm:$0xff] }
  0x3e   : > { %1383 = vmatprep.subr.mxu0 %v283_v32  ;;  %v277_v50 = vld [vmem:[#allocation2 + $0x70] sm:$0xff]  ;;  %v278_v51 = vld [vmem:[#allocation2 + $0x78] sm:$0xff]  ;;  %v504_v57 = vld [vmem:[#allocation4 + $0xc0] sm:$0xff] }
  0x3f   : > { %1384 = vmatpush3.msra.mxu0 %v283_v32  ;;  %v509_v52 = vld [vmem:[#allocation4 + $0xe8] sm:$0xff]  ;;  %v507_v54 = vld [vmem:[#allocation4 + $0xd8] sm:$0xff]  ;;  %v500_v61 = vld [vmem:[#allocation4 + $0xa0] sm:$0xff] }
  0x40   : > { %1385 = vmatprep.subr.mxu0 %v282_v33  ;;  %1421 = vmatprep.subr.mxu1 %v509_v52  ;;  %v505_v56 = vld [vmem:[#allocation4 + $0xc8] sm:$0xff]  ;;  %v503_v58 = vld [vmem:[#allocation4 + $0xb8] sm:$0xff]  ;;  %v496_v1 = vld [vmem:[#allocation4 + $0x80] sm:$0xff] }
  0x41   : > { %1386 = vmatpush3.msra.mxu0 %v282_v33  ;;  %1422 = vmatpush3.msra.mxu1 %v509_v52  ;;  %v501_v60 = vld [vmem:[#allocation4 + $0xa8] sm:$0xff]  ;;  %v499_v62 = vld [vmem:[#allocation4 + $0x98] sm:$0xff]  ;;  %v728_v3 = vld [vmem:[#allocation4 + $0x170] sm:$0xff] }
  0x42   : > { %1387 = vmatprep.subr.mxu0 %v281_v34  ;;  %1423 = vmatprep.subr.mxu1 %v508_v53  ;;  %v497_v0 = vld [vmem:[#allocation4 + $0x88] sm:$0xff]  ;;  %v729_v2 = vld [vmem:[#allocation4 + $0x178] sm:$0xff] }
  0x43   : > { %1388 = vmatpush3.msra.mxu0 %v281_v34  ;;  %1424 = vmatpush3.msra.mxu1 %v508_v53  ;;  %v727_v4 = vld [vmem:[#allocation4 + $0x168] sm:$0xff]  ;;  %v1225_v5 = vld [vmem:[%s2035_s2] ss:$0 sm:$0xff] }
  0x44   : > { %1389 = vmatprep.subr.mxu0 %v280_v35  ;;  %1425 = vmatprep.subr.mxu1 %v507_v54 }
  0x45   : > { %1390 = vmatpush3.msra.mxu0 %v280_v35  ;;  %1426 = vmatpush3.msra.mxu1 %v507_v54  ;;  %v726_v54 = vld [vmem:[#allocation4 + $0x160] sm:$0xff] }
  0x46   : > { %1391 = vmatprep.subr.mxu0 %v279_v36  ;;  %1427 = vmatprep.subr.mxu1 %v506_v55 }
  0x47   : > { %1392 = vmatpush3.msra.mxu0 %v279_v36  ;;  %1428 = vmatpush3.msra.mxu1 %v506_v55  ;;  %v725_v55 = vld [vmem:[#allocation4 + $0x158] sm:$0xff] }
  0x48   : > { %1394 = vmatmul.mubr.f32.vlgmr.msra.gmra.mxu0 %v264_v37  ;;  %1429 = vmatprep.subr.mxu1 %v505_v56 }
  0x49   : > { %1396 = vmatprep.mubr.f32.mxu0 %v265_v38  ;;  %1430 = vmatpush3.msra.mxu1 %v505_v56  ;;  %v724_v56 = vld [vmem:[#allocation4 + $0x150] sm:$0xff] }
  0x4a   : > { %1431 = vmatprep.subr.mxu1 %v504_v57  ;;  %1473 = vmatprep.subr.mxu0 %v729_v2 }
  0x4b   : > { %1432 = vmatpush3.msra.mxu1 %v504_v57  ;;  %1474 = vmatpush3.msra.mxu0 %v729_v2  ;;  %v723_v57 = vld [vmem:[#allocation4 + $0x148] sm:$0xff]  ;;  %v714_v2 = vld [vmem:[#allocation4 + $0x100] sm:$0xff] }
  0x4c   : > { %1397 = vmatmul.mubr.f32.gmra.mxu0 %v266_v39  ;;  %1433 = vmatprep.subr.mxu1 %v503_v58 }
  0x4d   : > { %1399 = vmatprep.mubr.f32.mxu0 %v267_v40  ;;  %1434 = vmatpush3.msra.mxu1 %v503_v58  ;;  %v722_v58 = vld [vmem:[#allocation4 + $0x140] sm:$0xff] }
  0x4e   : > { %1435 = vmatprep.subr.mxu1 %v502_v59  ;;  %1475 = vmatprep.subr.mxu0 %v728_v3 }
  0x4f   : > { %1436 = vmatpush3.msra.mxu1 %v502_v59  ;;  %1476 = vmatpush3.msra.mxu0 %v728_v3  ;;  %v721_v59 = vld [vmem:[#allocation4 + $0x138] sm:$0xff] }
  0x50   : > { %1400 = vmatmul.mubr.f32.gmra.mxu0 %v268_v41  ;;  %1437 = vmatprep.subr.mxu1 %v501_v60  ;;  %v947_v3 = vld [vmem:[#allocation4 + $0x1f8] sm:$0xff] }
  0x51   : > { %1402 = vmatprep.mubr.f32.mxu0 %v269_v42  ;;  %1438 = vmatpush3.msra.mxu1 %v501_v60  ;;  %v720_v60 = vld [vmem:[#allocation4 + $0x130] sm:$0xff] }
  0x52   : > { %1439 = vmatprep.subr.mxu1 %v500_v61  ;;  %1477 = vmatprep.subr.mxu0 %v727_v4 }
  0x53   : > { %1440 = vmatpush3.msra.mxu1 %v500_v61  ;;  %1478 = vmatpush3.msra.mxu0 %v727_v4  ;;  %v719_v61 = vld [vmem:[#allocation4 + $0x128] sm:$0xff]  ;;  %v946_v4 = vld [vmem:[#allocation4 + $0x1f0] sm:$0xff] }
  0x54   : > { %1403 = vmatmul.mubr.f32.gmra.mxu0 %v270_v43  ;;  %1441 = vmatprep.subr.mxu1 %v499_v62 }
  0x55   : > { %1405 = vmatprep.mubr.f32.mxu0 %v271_v44  ;;  %1442 = vmatpush3.msra.mxu1 %v499_v62  ;;  %v718_v62 = vld [vmem:[#allocation4 + $0x120] sm:$0xff] }
  0x56   : > { %1443 = vmatprep.subr.mxu1 %v498_v63  ;;  %1479 = vmatprep.subr.mxu0 %v726_v54 }
  0x57   : > { %1444 = vmatpush3.msra.mxu1 %v498_v63  ;;  %1480 = vmatpush3.msra.mxu0 %v726_v54  ;;  %v717_v63 = vld [vmem:[#allocation4 + $0x118] sm:$0xff] }
  0x58   : > { %1406 = vmatmul.mubr.f32.gmra.mxu0 %v272_v45  ;;  %1445 = vmatprep.subr.mxu1 %v497_v0 }
  0x59   : > { %1408 = vmatprep.mubr.f32.mxu0 %v273_v46  ;;  %1446 = vmatpush3.msra.mxu1 %v497_v0  ;;  %v716_v0 = vld [vmem:[#allocation4 + $0x110] sm:$0xff] }
  0x5a   : > { %1447 = vmatprep.subr.mxu1 %v496_v1  ;;  %1481 = vmatprep.subr.mxu0 %v725_v55 }
  0x5b   : > { %1448 = vmatpush3.msra.mxu1 %v496_v1  ;;  %1482 = vmatpush3.msra.mxu0 %v725_v55  ;;  %v715_v1 = vld [vmem:[#allocation4 + $0x108] sm:$0xff]  ;;  %v944_v55 = vld [vmem:[#allocation4 + $0x1e0] sm:$0xff] }
  0x5c   : > { %1409 = vmatmul.mubr.f32.gmra.mxu0 %v274_v47  ;;  %1483 = vmatprep.subr.mxu0 %v724_v56 }
  0x5d   : > { %1411 = vmatprep.mubr.f32.mxu0 %v275_v48  ;;  %1484 = vmatpush3.msra.mxu0 %v724_v56  ;;  %v943_v56 = vld [vmem:[#allocation4 + $0x1d8] sm:$0xff] }
  0x5e   : > { %1485 = vmatprep.subr.mxu0 %v723_v57  ;;  %1529 = vmatprep.subr.mxu1 %v947_v3 }
  0x5f   : > { %1486 = vmatpush3.msra.mxu0 %v723_v57  ;;  %v942_v57 = vld [vmem:[#allocation4 + $0x1d0] sm:$0xff] }
  0x60   : > { %1412 = vmatmul.mubr.f32.gmra.mxu0 %v276_v49  ;;  %1487 = vmatprep.subr.mxu0 %v722_v58 }
  0x61   : > { %1414 = vmatprep.mubr.f32.mxu0 %v277_v50  ;;  %1488 = vmatpush3.msra.mxu0 %v722_v58  ;;  %v941_v58 = vld [vmem:[#allocation4 + $0x1c8] sm:$0xff] }
  0x62   : > { %1489 = vmatprep.subr.mxu0 %v721_v59 }
  0x63   : > { %1490 = vmatpush3.msra.mxu0 %v721_v59  ;;  %v940_v59 = vld [vmem:[#allocation4 + $0x1c0] sm:$0xff] }
  0x64   : > { %1415 = vmatmul.mubr.f32.gmra.mxu0 %v278_v51  ;;  %1491 = vmatprep.subr.mxu0 %v720_v60 }
  0x65   : > { %1492 = vmatpush3.msra.mxu0 %v720_v60  ;;  %v939_v60 = vld [vmem:[#allocation4 + $0x1b8] sm:$0xff] }
  0x66   : > { %1493 = vmatprep.subr.mxu0 %v719_v61 }
  0x67   : > { %1494 = vmatpush3.msra.mxu0 %v719_v61  ;;  %v938_v61 = vld [vmem:[#allocation4 + $0x1b0] sm:$0xff] }
  0x68   : > { %1495 = vmatprep.subr.mxu0 %v718_v62 }
  0x69   : > { %1496 = vmatpush3.msra.mxu0 %v718_v62  ;;  %v937_v62 = vld [vmem:[#allocation4 + $0x1a8] sm:$0xff] }
  0x6a   : > { %1497 = vmatprep.subr.mxu0 %v717_v63 }
  0x6b   : > { %1498 = vmatpush3.msra.mxu0 %v717_v63  ;;  %v936_v63 = vld [vmem:[#allocation4 + $0x1a0] sm:$0xff] }
  0x6c   : > { %1499 = vmatprep.subr.mxu0 %v716_v0 }
  0x6d   : > { %1500 = vmatpush3.msra.mxu0 %v716_v0  ;;  %v935_v0 = vld [vmem:[#allocation4 + $0x198] sm:$0xff] }
  0x6e   : > { %1501 = vmatprep.subr.mxu0 %v715_v1 }
  0x6f   : > { %1502 = vmatpush3.msra.mxu0 %v715_v1  ;;  %v934_v1 = vld [vmem:[#allocation4 + $0x190] sm:$0xff] }
  0x70   : > { %1503 = vmatprep.subr.mxu0 %v714_v2 }
  0x71   : > { %1504 = vmatpush3.msra.mxu0 %v714_v2  ;;  %v933_v2 = vld [vmem:[#allocation4 + $0x188] sm:$0xff] }
 0x108   : > { %v1395_v6 = vpop.f32.mrf.mxu0 }
 0x109   : > { %v374_v7 = vadd.f32 %v1395_v6, %v1225_v5  ;;  %v1227_v6 = vld [vmem:[%s2035_s2 + $0x1] ss:$0 sm:$0xff] }
 0x10a   : > { %v368_v8 = vpop.f32.mrf.mxu0 }
 0x10b   : > { %v369_v9 = vadd.f32 %v1225_v5, %v368_v8 }
 0x10c   : > { %v1398_v10 = vpop.f32.mrf.mxu0 }
 0x10d   : > { %1640 = vtanh.f32 %v369_v9  ;;  %v384_v11 = vadd.f32 %v1398_v10, %v1225_v5 }
 0x10e   : > { %1642 = vtanh.f32 %v374_v7  ;;  %v378_v12 = vpop.f32.mrf.mxu0 }
 0x10f   : > { %v379_v13 = vadd.f32 %v1225_v5, %v378_v12  ;;  %1644 = vtanh.f32 %v384_v11 }
 0x110   : > { %v1401_v14 = vpop.f32.mrf.mxu0 }
 0x111   : > { %1646 = vtanh.f32 %v379_v13  ;;  %v394_v15 = vadd.f32 %v1401_v14, %v1225_v5 }
 0x112   : > { %v388_v16 = vpop.f32.mrf.mxu0 }
 0x113   : > { %v389_v17 = vadd.f32 %v1225_v5, %v388_v16  ;;  %1648 = vtanh.f32 %v394_v15 }
 0x114   : > { %v1404_v18 = vpop.f32.mrf.mxu0 }
 0x115   : > { %1650 = vtanh.f32 %v389_v17  ;;  %v404_v19 = vadd.f32 %v1404_v18, %v1225_v5 }
 0x116   : > { %v398_v20 = vpop.f32.mrf.mxu0 }
 0x117   : > { %v399_v21 = vadd.f32 %v1225_v5, %v398_v20  ;;  %1652 = vtanh.f32 %v404_v19 }
 0x118   : > { %v1407_v22 = vpop.f32.mrf.mxu0 }
 0x119   : > { %1654 = vtanh.f32 %v399_v21  ;;  %v414_v23 = vadd.f32 %v1407_v22, %v1225_v5 }
 0x11a   : > { %v1641_v24 = vpop.eup %1640  ;;  %v408_v25 = vpop.f32.mrf.mxu0 }
 0x11b   : > { %v1643_v26 = vpop.eup %1642  ;;  %v409_v27 = vadd.f32 %v1225_v5, %v408_v25  ;;  %1449 = vmatprep.mubr.f32.mxu1 %v1641_v24  ;;  %1656 = vtanh.f32 %v414_v23 }
 0x11c   : > { %1450 = vmatmul.mubr.f32.vlgmr.msra.gmra.mxu1 %v1643_v26  ;;  %v1410_v28 = vpop.f32.mrf.mxu0  ;;  %v1645_v29 = vpop.eup %1644 }
 0x11d   : > { %1658 = vtanh.f32 %v409_v27  ;;  %v424_v30 = vadd.f32 %v1410_v28, %v1225_v5  ;;  %1530 = vmatpush3.msra.mxu1 %v947_v3  ;;  %v932_v3 = vld [vmem:[#allocation4 + $0x180] sm:$0xff] }
 0x11e   : > { %v1647_v31 = vpop.eup %1646  ;;  %v418_v32 = vpop.f32.mrf.mxu0  ;;  %1531 = vmatprep.subr.mxu1 %v946_v4 }
 0x11f   : > { %v419_v33 = vadd.f32 %v1225_v5, %v418_v32  ;;  %1452 = vmatprep.mubr.f32.mxu1 %v1647_v31  ;;  %1660 = vtanh.f32 %v424_v30  ;;  %1532 = vmatpush3.msra.mxu1 %v946_v4  ;;  %v1125_v4 = vld [vmem:[#allocation3] sm:$0x1] }
 0x120   : > { %1453 = vmatmul.mubr.f32.gmra.mxu1 %v1645_v29  ;;  %v1413_v34 = vpop.f32.mrf.mxu0  ;;  %v1649_v35 = vpop.eup %1648 }
 0x121   : > { %1662 = vtanh.f32 %v419_v33  ;;  %v434_v36 = vadd.f32 %v1413_v34, %v1225_v5 }
 0x122   : > { %v1651_v37 = vpop.eup %1650  ;;  %v428_v38 = vpop.f32.mrf.mxu0 }
 0x123   : > { %1455 = vmatprep.mubr.f32.mxu1 %v1651_v37  ;;  %v429_v39 = vadd.f32 %v1225_v5, %v428_v38  ;;  %1664 = vtanh.f32 %v434_v36 }
 0x124   : > { %1456 = vmatmul.mubr.f32.gmra.mxu1 %v1649_v35  ;;  %v1416_v40 = vpop.f32.mrf.mxu0  ;;  %v1653_v41 = vpop.eup %1652 }
 0x125   : > { %1666 = vtanh.f32 %v429_v39  ;;  %v444_v42 = vadd.f32 %v1416_v40, %v1225_v5 }
 0x126   : > { %v1655_v43 = vpop.eup %1654  ;;  %v438_v44 = vpop.f32.mrf.mxu0 }
 0x127   : > { %1458 = vmatprep.mubr.f32.mxu1 %v1655_v43  ;;  %v439_v45 = vadd.f32 %v1225_v5, %v438_v44  ;;  %1668 = vtanh.f32 %v444_v42  ;;  %v945_v5 = vld [vmem:[#allocation4 + $0x1e8] sm:$0xff] }
 0x128   : > { %1459 = vmatmul.mubr.f32.gmra.mxu1 %v1653_v41  ;;  %v1657_v46 = vpop.eup %1656  ;;  %1533 = vmatprep.subr.mxu1 %v945_v5 }
 0x129   : > { %1670 = vtanh.f32 %v439_v45  ;;  %1534 = vmatpush3.msra.mxu1 %v945_v5  ;;  %v1832_v5 = vmov 0  }
 0x12a   : > { %v1659_v47 = vpop.eup %1658  ;;  %1535 = vmatprep.subr.mxu1 %v944_v55  ;;  %1639 = vset.pattern.permute.xlu0 %v1832_v5 }
 0x12b   : > { %1461 = vmatprep.mubr.f32.mxu1 %v1659_v47  ;;  %1536 = vmatpush3.msra.mxu1 %v944_v55 }
 0x12c   : > { %1462 = vmatmul.mubr.f32.gmra.mxu1 %v1657_v46  ;;  %v1661_v48 = vpop.eup %1660  ;;  %1537 = vmatprep.subr.mxu1 %v943_v56 }
 0x12d   : > { %1538 = vmatpush3.msra.mxu1 %v943_v56  ;;  %1128 = vperm.xlu0 %1639, %v1125_v4  }
 0x12e   : > { %v1663_v49 = vpop.eup %1662  ;;  %1539 = vmatprep.subr.mxu1 %v942_v57 }
 0x12f   : > { %1464 = vmatprep.mubr.f32.mxu1 %v1663_v49  ;;  %1540 = vmatpush3.msra.mxu1 %v942_v57 }
 0x130   : > { %1465 = vmatmul.mubr.f32.gmra.mxu1 %v1661_v48  ;;  %v1665_v50 = vpop.eup %1664  ;;  %1541 = vmatprep.subr.mxu1 %v941_v58 }
 0x131   : > { %1542 = vmatpush3.msra.mxu1 %v941_v58 }
 0x132   : > { %v1667_v51 = vpop.eup %1666  ;;  %1543 = vmatprep.subr.mxu1 %v940_v59 }
 0x133   : > { %1467 = vmatprep.mubr.f32.mxu1 %v1667_v51  ;;  %1544 = vmatpush3.msra.mxu1 %v940_v59 }
 0x134   : > { %1468 = vmatmul.mubr.f32.gmra.mxu1 %v1665_v50  ;;  %v1669_v52 = vpop.eup %1668  ;;  %1545 = vmatprep.subr.mxu1 %v939_v60 }
 0x135   : > { %1546 = vmatpush3.msra.mxu1 %v939_v60 }
 0x136   : > { %v1671_v53 = vpop.eup %1670  ;;  %1547 = vmatprep.subr.mxu1 %v938_v61 }
 0x137   : > { %1470 = vmatprep.mubr.f32.mxu1 %v1671_v53  ;;  %1548 = vmatpush3.msra.mxu1 %v938_v61 }
 0x138   : > { %1471 = vmatmul.mubr.f32.gmra.mxu1 %v1669_v52  ;;  %1549 = vmatprep.subr.mxu1 %v937_v62 }
 0x139   : > { %1550 = vmatpush3.msra.mxu1 %v937_v62 }
 0x13a   : > { %1551 = vmatprep.subr.mxu1 %v936_v63 }
 0x13b   : > { %1552 = vmatpush3.msra.mxu1 %v936_v63 }
 0x13c   : > { %1553 = vmatprep.subr.mxu1 %v935_v0 }
 0x13d   : > { %1554 = vmatpush3.msra.mxu1 %v935_v0 }
 0x13e   : > { %1555 = vmatprep.subr.mxu1 %v934_v1 }
 0x13f   : > { %1556 = vmatpush3.msra.mxu1 %v934_v1 }
 0x140   : > { %1557 = vmatprep.subr.mxu1 %v933_v2 }
 0x141   : > { %1558 = vmatpush3.msra.mxu1 %v933_v2 }
 0x142   : > { %1559 = vmatprep.subr.mxu1 %v932_v3 }
 0x143   : > { %1560 = vmatpush3.msra.mxu1 %v932_v3 }
 0x1dc   : > { %v1451_v7 = vpop.f32.mrf.mxu1 }
 0x1dd   : > { %v592_v8 = vadd.f32 %v1451_v7, %v1227_v6 }
 0x1de   : > { %v586_v9 = vpop.f32.mrf.mxu1 }
 0x1df   : > { %v587_v10 = vadd.f32 %v1227_v6, %v586_v9 }
 0x1e0   : > { %v1454_v11 = vpop.f32.mrf.mxu1 }
 0x1e1   : > { %1672 = vtanh.f32 %v587_v10  ;;  %v602_v12 = vadd.f32 %v1454_v11, %v1227_v6 }
 0x1e2   : > { %1674 = vtanh.f32 %v592_v8  ;;  %v596_v13 = vpop.f32.mrf.mxu1 }
 0x1e3   : > { %v597_v14 = vadd.f32 %v1227_v6, %v596_v13 }
 0x1e4   : > { %v1457_v15 = vpop.f32.mrf.mxu1 }
 0x1e5   : > { %1676 = vtanh.f32 %v597_v14  ;;  %v612_v16 = vadd.f32 %v1457_v15, %v1227_v6 }
 0x1e6   : > { %1678 = vtanh.f32 %v602_v12  ;;  %v606_v17 = vpop.f32.mrf.mxu1 }
 0x1e7   : > { %v607_v18 = vadd.f32 %v1227_v6, %v606_v17  ;;  %1680 = vtanh.f32 %v612_v16 }
 0x1e8   : > { %v1460_v19 = vpop.f32.mrf.mxu1 }
 0x1e9   : > { %1682 = vtanh.f32 %v607_v18  ;;  %v622_v20 = vadd.f32 %v1460_v19, %v1227_v6 }
 0x1ea   : > { %v616_v21 = vpop.f32.mrf.mxu1 }
 0x1eb   : > { %v617_v22 = vadd.f32 %v1227_v6, %v616_v21  ;;  %1684 = vtanh.f32 %v622_v20 }
 0x1ec   : > { %v1463_v23 = vpop.f32.mrf.mxu1 }
 0x1ed   : > { %1686 = vtanh.f32 %v617_v22  ;;  %v632_v24 = vadd.f32 %v1463_v23, %v1227_v6 }
 0x1ee   : > { %v1673_v25 = vpop.eup %1672  ;;  %v626_v26 = vpop.f32.mrf.mxu1 }
 0x1ef   : > { %v1675_v27 = vpop.eup %1674  ;;  %v627_v28 = vadd.f32 %v1227_v6, %v626_v26  ;;  %1505 = vmatprep.mubr.f32.mxu0 %v1673_v25  ;;  %1688 = vtanh.f32 %v632_v24 }
 0x1f0   : > { %1506 = vmatmul.mubr.f32.vlgmr.msra.gmra.mxu0 %v1675_v27  ;;  %v1466_v29 = vpop.f32.mrf.mxu1 }
 0x1f1   : > { %1690 = vtanh.f32 %v627_v28  ;;  %v642_v30 = vadd.f32 %v1466_v29, %v1227_v6 }
 0x1f2   : > { %v1677_v31 = vpop.eup %1676  ;;  %v636_v32 = vpop.f32.mrf.mxu1 }
 0x1f3   : > { %v1679_v33 = vpop.eup %1678  ;;  %v637_v34 = vadd.f32 %v1227_v6, %v636_v32  ;;  %1508 = vmatprep.mubr.f32.mxu0 %v1677_v31  ;;  %1692 = vtanh.f32 %v642_v30 }
 0x1f4   : > { %1509 = vmatmul.mubr.f32.gmra.mxu0 %v1679_v33  ;;  %v1469_v35 = vpop.f32.mrf.mxu1  ;;  %v1681_v36 = vpop.eup %1680 }
 0x1f5   : > { %1694 = vtanh.f32 %v637_v34  ;;  %v652_v37 = vadd.f32 %v1469_v35, %v1227_v6 }
 0x1f6   : > { %v1683_v38 = vpop.eup %1682  ;;  %v646_v39 = vpop.f32.mrf.mxu1 }
 0x1f7   : > { %1511 = vmatprep.mubr.f32.mxu0 %v1683_v38  ;;  %v647_v40 = vadd.f32 %v1227_v6, %v646_v39  ;;  %1696 = vtanh.f32 %v652_v37 }
 0x1f8   : > { %1512 = vmatmul.mubr.f32.gmra.mxu0 %v1681_v36  ;;  %v1472_v41 = vpop.f32.mrf.mxu1  ;;  %v1685_v42 = vpop.eup %1684 }
 0x1f9   : > { %1698 = vtanh.f32 %v647_v40  ;;  %v662_v43 = vadd.f32 %v1472_v41, %v1227_v6 }
 0x1fa   : > { %v1687_v44 = vpop.eup %1686  ;;  %v656_v45 = vpop.f32.mrf.mxu1 }
 0x1fb   : > { %1514 = vmatprep.mubr.f32.mxu0 %v1687_v44  ;;  %v657_v46 = vadd.f32 %v1227_v6, %v656_v45  ;;  %1700 = vtanh.f32 %v662_v43  ;;  %v1981_v6 = vld [vmem:[%s2035_s2 + $0x2] ss:$0 sm:$0xff] }
 0x1fc   : > { %1515 = vmatmul.mubr.f32.gmra.mxu0 %v1685_v42  ;;  %v1689_v47 = vpop.eup %1688 }
 0x1fd   : > { %1702 = vtanh.f32 %v657_v46 }
 0x1fe   : > { %v1691_v48 = vpop.eup %1690 }
 0x1ff   : > { %1517 = vmatprep.mubr.f32.mxu0 %v1691_v48 }
 0x200   : > { %1518 = vmatmul.mubr.f32.gmra.mxu0 %v1689_v47  ;;  %v1693_v49 = vpop.eup %1692 }
 0x202   : > { %v1695_v50 = vpop.eup %1694 }
 0x203   : > { %1520 = vmatprep.mubr.f32.mxu0 %v1695_v50 }
 0x204   : > { %1521 = vmatmul.mubr.f32.gmra.mxu0 %v1693_v49  ;;  %v1697_v51 = vpop.eup %1696 }
 0x206   : > { %v1699_v52 = vpop.eup %1698 }
 0x207   : > { %1523 = vmatprep.mubr.f32.mxu0 %v1699_v52 }
 0x208   : > { %1524 = vmatmul.mubr.f32.gmra.mxu0 %v1697_v51  ;;  %v1701_v53 = vpop.eup %1700 }
 0x20a   : > { %v1703_v54 = vpop.eup %1702 }
 0x20b   : > { %1526 = vmatprep.mubr.f32.mxu0 %v1703_v54 }
 0x20c   : > { %1527 = vmatmul.mubr.f32.gmra.mxu0 %v1701_v53 }
 0x2b0   : > { %v1507_v7 = vpop.f32.mrf.mxu0 }
 0x2b1   : > { %v810_v8 = vadd.f32 %v1507_v7, %v1981_v6  ;;  %v1131_v7 = vlaneseq }
 0x2b2   : > { %v804_v9 = vpop.f32.mrf.mxu0 }
 0x2b3   : > { %1704 = vtanh.f32 %v810_v8  ;;  %v805_v10 = vadd.f32 %v1981_v6, %v804_v9  ;;  %v1132_v8 = vshrl.u32 %v1131_v7, 7 }
 0x2b4   : > { %v1510_v11 = vpop.f32.mrf.mxu0 }
 0x2b5   : > { %1706 = vtanh.f32 %v805_v10  ;;  %v820_v12 = vadd.f32 %v1510_v11, %v1981_v6  ;;  %v1133_v9 = vsub.s32 0, %v1132_v8  ;;  %v1129_v10 = vpop.permute.xlu0 %1128 }
 0x2b6   : > { %v814_v13 = vpop.f32.mrf.mxu0 }
 0x2b7   : > { %1708 = vtanh.f32 %v820_v12  ;;  %v815_v14 = vadd.f32 %v1981_v6, %v814_v13  ;;  %v1134_v11 = vrot.slane %v1129_v10, %v1133_v9 }
 0x2b8   : > { %v1513_v15 = vpop.f32.mrf.mxu0 }
 0x2b9   : > { %1710 = vtanh.f32 %v815_v14  ;;  %v830_v16 = vadd.f32 %v1513_v15, %v1981_v6 }
 0x2ba   : > { %v824_v17 = vpop.f32.mrf.mxu0 }
 0x2bb   : > { %1712 = vtanh.f32 %v830_v16  ;;  %v825_v18 = vadd.f32 %v1981_v6, %v824_v17 }
 0x2bc   : > { %v1516_v19 = vpop.f32.mrf.mxu0 }
 0x2bd   : > { %1714 = vtanh.f32 %v825_v18  ;;  %v840_v20 = vadd.f32 %v1516_v19, %v1981_v6 }
 0x2be   : > { %v834_v21 = vpop.f32.mrf.mxu0 }
 0x2bf   : > { %1716 = vtanh.f32 %v840_v20  ;;  %v835_v22 = vadd.f32 %v1981_v6, %v834_v21 }
 0x2c0   : > { %v1705_v23 = vpop.eup %1704  ;;  %v1519_v24 = vpop.f32.mrf.mxu0 }
 0x2c1   : > { %900 = vst [vmem:[#allocation2 + $0x8] sm:$0xff] %v1705_v23  ;;  %1718 = vtanh.f32 %v835_v22  ;;  %v850_v25 = vadd.f32 %v1519_v24, %v1981_v6 }
 0x2c2   : > { %v1707_v26 = vpop.eup %1706  ;;  %v844_v27 = vpop.f32.mrf.mxu0 }
 0x2c3   : > { %899 = vst [vmem:[#allocation2] sm:$0xff] %v1707_v26  ;;  %1720 = vtanh.f32 %v850_v25  ;;  %v845_v28 = vadd.f32 %v1981_v6, %v844_v27  ;;  %1561 = vmatprep.mubr.f32.mxu1 %v1707_v26 }
 0x2c4   : > { %v1709_v29 = vpop.eup %1708  ;;  %1562 = vmatmul.mubr.f32.vlgmr.msra.gmra.mxu1 %v1705_v23  ;;  %v1522_v30 = vpop.f32.mrf.mxu0 }
 0x2c5   : > { %902 = vst [vmem:[#allocation2 + $0x18] sm:$0xff] %v1709_v29  ;;  %1722 = vtanh.f32 %v845_v28  ;;  %v860_v31 = vadd.f32 %v1522_v30, %v1981_v6 }
 0x2c6   : > { %v1711_v32 = vpop.eup %1710  ;;  %v854_v33 = vpop.f32.mrf.mxu0 }
 0x2c7   : > { %901 = vst [vmem:[#allocation2 + $0x10] sm:$0xff] %v1711_v32  ;;  %1724 = vtanh.f32 %v860_v31  ;;  %v855_v34 = vadd.f32 %v1981_v6, %v854_v33  ;;  %1564 = vmatprep.mubr.f32.mxu1 %v1711_v32 }
 0x2c8   : > { %v1713_v35 = vpop.eup %1712  ;;  %1565 = vmatmul.mubr.f32.gmra.mxu1 %v1709_v29  ;;  %v1525_v36 = vpop.f32.mrf.mxu0 }
 0x2c9   : > { %904 = vst [vmem:[#allocation2 + $0x28] sm:$0xff] %v1713_v35  ;;  %1726 = vtanh.f32 %v855_v34  ;;  %v870_v37 = vadd.f32 %v1525_v36, %v1981_v6 }
 0x2ca   : > { %v1715_v38 = vpop.eup %1714  ;;  %v864_v39 = vpop.f32.mrf.mxu0 }
 0x2cb   : > { %903 = vst [vmem:[#allocation2 + $0x20] sm:$0xff] %v1715_v38  ;;  %1567 = vmatprep.mubr.f32.mxu1 %v1715_v38  ;;  %1728 = vtanh.f32 %v870_v37  ;;  %v865_v40 = vadd.f32 %v1981_v6, %v864_v39 }
 0x2cc   : > { %v1717_v41 = vpop.eup %1716  ;;  %1568 = vmatmul.mubr.f32.gmra.mxu1 %v1713_v35  ;;  %v1528_v42 = vpop.f32.mrf.mxu0 }
 0x2cd   : > { %906 = vst [vmem:[#allocation2 + $0x38] sm:$0xff] %v1717_v41  ;;  %1730 = vtanh.f32 %v865_v40  ;;  %v880_v43 = vadd.f32 %v1528_v42, %v1981_v6 }
 0x2ce   : > { %v1719_v44 = vpop.eup %1718  ;;  %v874_v45 = vpop.f32.mrf.mxu0 }
 0x2cf   : > { %905 = vst [vmem:[#allocation2 + $0x30] sm:$0xff] %v1719_v44  ;;  %1570 = vmatprep.mubr.f32.mxu1 %v1719_v44  ;;  %1732 = vtanh.f32 %v880_v43  ;;  %v875_v46 = vadd.f32 %v1981_v6, %v874_v45 }
 0x2d0   : > { %v1721_v47 = vpop.eup %1720  ;;  %1571 = vmatmul.mubr.f32.gmra.mxu1 %v1717_v41 }
 0x2d1   : > { %908 = vst [vmem:[#allocation2 + $0x48] sm:$0xff] %v1721_v47  ;;  %1734 = vtanh.f32 %v875_v46 }
 0x2d2   : > { %v1723_v48 = vpop.eup %1722 }
 0x2d3   : > { %907 = vst [vmem:[#allocation2 + $0x40] sm:$0xff] %v1723_v48  ;;  %1573 = vmatprep.mubr.f32.mxu1 %v1723_v48 }
 0x2d4   : > { %v1725_v49 = vpop.eup %1724  ;;  %1574 = vmatmul.mubr.f32.gmra.mxu1 %v1721_v47 }
 0x2d5   : > { %910 = vst [vmem:[#allocation2 + $0x58] sm:$0xff] %v1725_v49 }
 0x2d6   : > { %v1727_v50 = vpop.eup %1726 }
 0x2d7   : > { %909 = vst [vmem:[#allocation2 + $0x50] sm:$0xff] %v1727_v50  ;;  %1576 = vmatprep.mubr.f32.mxu1 %v1727_v50 }
 0x2d8   : > { %v1729_v51 = vpop.eup %1728  ;;  %1577 = vmatmul.mubr.f32.gmra.mxu1 %v1725_v49 }
 0x2d9   : > { %912 = vst [vmem:[#allocation2 + $0x68] sm:$0xff] %v1729_v51 }
 0x2da   : > { %v1731_v52 = vpop.eup %1730 }
 0x2db   : > { %911 = vst [vmem:[#allocation2 + $0x60] sm:$0xff] %v1731_v52  ;;  %1579 = vmatprep.mubr.f32.mxu1 %v1731_v52 }
 0x2dc   : > { %v1733_v53 = vpop.eup %1732  ;;  %1580 = vmatmul.mubr.f32.gmra.mxu1 %v1729_v51 }
 0x2dd   : > { %914 = vst [vmem:[#allocation2 + $0x78] sm:$0xff] %v1733_v53 }
 0x2de   : > { %v1735_v54 = vpop.eup %1734 }
 0x2df   : > { %913 = vst [vmem:[#allocation2 + $0x70] sm:$0xff] %v1735_v54  ;;  %1582 = vmatprep.mubr.f32.mxu1 %v1735_v54 }
 0x2e0   : > { %1583 = vmatmul.mubr.f32.gmra.mxu1 %v1733_v53 }
 0x384   : > { %v1563_v55 = vpop.f32.mrf.mxu1 }
 0x386   : > { %v1014_v56 = vpop.f32.mrf.mxu1 }
 0x387   : > { %1093 = vxpose.xlu0.b32.start [1/16] (narrow) %v1014_v56, 8 }
 0x388   : > { %v1566_v57 = vpop.f32.mrf.mxu1 }
 0x38a   : > { %v1024_v58 = vpop.f32.mrf.mxu1 }
 0x38b   : > { %1094 = vxpose.xlu0.b32.cont [2/16] (narrow) %v1563_v55, 8 }
 0x38c   : > { %v1569_v59 = vpop.f32.mrf.mxu1 }
 0x38e   : > { %v1034_v60 = vpop.f32.mrf.mxu1 }
 0x38f   : > { %1095 = vxpose.xlu0.b32.cont [3/16] (narrow) %v1024_v58, 8 }
 0x390   : > { %v1572_v61 = vpop.f32.mrf.mxu1 }
 0x392   : > { %v1044_v62 = vpop.f32.mrf.mxu1 }
 0x393   : > { %1096 = vxpose.xlu0.b32.cont [4/16] (narrow) %v1566_v57, 8 }
 0x394   : > { %v1575_v63 = vpop.f32.mrf.mxu1 }
 0x396   : > { %v1054_v0 = vpop.f32.mrf.mxu1 }
 0x397   : > { %1097 = vxpose.xlu0.b32.cont [5/16] (narrow) %v1034_v60, 8 }
 0x398   : > { %v1578_v1 = vpop.f32.mrf.mxu1 }
 0x39a   : > { %v1064_v2 = vpop.f32.mrf.mxu1 }
 0x39b   : > { %1098 = vxpose.xlu0.b32.cont [6/16] (narrow) %v1569_v59, 8 }
 0x39c   : > { %v1581_v3 = vpop.f32.mrf.mxu1 }
 0x39e   : > { %v1074_v4 = vpop.f32.mrf.mxu1 }
 0x39f   : > { %1099 = vxpose.xlu0.b32.cont [7/16] (narrow) %v1044_v62, 8 }
 0x3a0   : > { %v1584_v5 = vpop.f32.mrf.mxu1 }
 0x3a2   : > { %v1084_v6 = vpop.f32.mrf.mxu1 }
 0x3a3   : > { %1100 = vxpose.xlu0.b32.cont [8/16] (narrow) %v1572_v61, 8 }
 0x3a7   : > { %1101 = vxpose.xlu0.b32.cont [9/16] (narrow) %v1054_v0, 8 }
 0x3ab   : > { %1102 = vxpose.xlu0.b32.cont [10/16] (narrow) %v1575_v63, 8 }
 0x3af   : > { %1103 = vxpose.xlu0.b32.cont [11/16] (narrow) %v1064_v2, 8 }
 0x3b3   : > { %1104 = vxpose.xlu0.b32.cont [12/16] (narrow) %v1578_v1, 8 }
 0x3b7   : > { %1105 = vxpose.xlu0.b32.cont [13/16] (narrow) %v1074_v4, 8 }
 0x3bb   : > { %1106 = vxpose.xlu0.b32.cont [14/16] (narrow) %v1581_v3, 8 }
 0x3bf   : > { %1107 = vxpose.xlu0.b32.cont [15/16] (narrow) %v1084_v6, 8 }
 0x3c3   : > { %1108 = vxpose.xlu0.b32.end [16/16] (narrow) %v1584_v5, 8 }
 0x403   : > { %v1109_v12 = vpop.trf.xlu0 }
 0x404   : > { %v1135_v13 = vadd.f32 %v1134_v11, %v1109_v12 }
 0x406   : > { %1136 = vst [vmem:[%s207_s30] sm:$0x1] %v1135_v13 }
 0x407   : > { %1775 = shalt.err (!%p1772_p0)
}
 0x408   : > { %s1776_s15 = scalar_lea.hbm %s1148_s8, 16  ;;  %s1780_s3 = scalar_lea.hbm %s2037_s4, 32 }
 0x409   : > { %p1777_p1 = scmp.ne.s32.totalorder %s1148_s8, %s1776_s15  ;;  %p1781_p4 = scmp.lt.s32.totalorder %s1148_s8, %s2037_s4 }
 0x40a   : > { %p1782_p7 = scmp.lt.s32.totalorder %s1780_s3, %s1776_s15 }
 0x40b   : > { %p1778_p2 = pnand %p1777_p1, %p1900_p5 }
 0x40c   : > { %p1783_p6 = por %p1782_p7, %p1781_p4 }
 0x40d   : > { %p1779_p3 = pneg %p1778_p2 }
 0x40f   : > { %p1784_p8 = pnand %p1783_p6, %p1779_p3 }
 0x411   : > { %1787 = shalt.err (!%p1784_p8)
}
 0x412   : > { %1589 = dma.vmem_to_hbm [thread:$0]  (%p1900_p5), %s1151_s5, 16, %s1148_s8, %s1138_s9  }
 0x413 PF: > { %p1601_p9 = scmp.ge.s32.totalorder %s1826_s20, 2  ;;  %s1162_s24 = sand.u32 1, %s1814_s17  }
 0x414   : > { %p2041_p10 = scmp.ne.s32.totalorder %s2039_s27, 0  ;;  %s1163_s28 = scalar_lea.sflag [#allocation6], %s1162_s24 }
 0x416   : > { %p1596_p11 = pnand %p1601_p9, %p2041_p10 }
 0x418   : > { %p1597_p12 = pneg %p1596_p11 }
 0x41a   : > { %1809 = dma.done.wait (%p1597_p12), %s1163_s28, 16  }
 0x41b   : > { %1811 = vsyncadd (%p1597_p12), %s1163_s28, 4294967280  ;;  %p17_p13 = scmp.ge.s32.totalorder %s1887_s22, 4   ;;  %s2042_s17 = smov %s1818_s18 }
 0x41c   : > { %s2043_s18 = smov %s1822_s19  ;;  %s2044_s19 = smov %s1898_s25 }
 0x41d   : > { %s2045_s20 = smov %s1887_s22  ;;  %19 = sbr.rel (!%p17_p13) target bundleno = 7 (0x7), region = 81 }
 0x422   :  { %1167 = vsyncpa [#allocation5], 1 }
 0x423   :  { %1169 = vsyncpa [#allocation5 + $0x1], 1 }
 0x424   :  { %1170 = vsyncpa [#allocation6], 1 }
 0x425   :  { %1172 = vsyncpa [#allocation6 + $0x1], 1 }

</bundles_post_ra>
